<compile_context>
chip_gen: v7x
topology: tpu7x:2x2x1
jax: 0.10.0
libtpu: 0.0.40
codegen_flags: <defaults>
</compile_context>

<pallas_src>
import functools

import jax
import jax.numpy as jnp
from jax.experimental import pallas as pl
from jax.experimental.pallas import tpu as pltpu


# ----------------------------------------------------------------------------
# Kernel
# ----------------------------------------------------------------------------
def _embedding_kernel(x_ref, o_ref, *, freqs, mode, anchor_every):
    """x_ref: (1, rb, W) tile of ONE input channel, lane-dense over batch.
    o_ref: (2*N_freqs+1, 1, rb, W) -- one full-width slab per embedding part."""
    x = x_ref[0].astype(jnp.float32)          # compute in f32 (v5e: no bf16 VPU/EUP)
    o_ref[0, 0] = x.astype(o_ref.dtype)       # identity part

    if mode == "linear" and len(freqs) > 1:
        # equally spaced frequencies -> one extra sin/cos pair for the step
        d = float(freqs[1] - freqs[0])
        ad = d * x
        sd, cd = jnp.sin(ad), jnp.cos(ad)

    s = c = None
    for k, f in enumerate(freqs):             # static python floats -> unrolled
        if k % anchor_every == 0:
            a = f * x                         # pow2 freqs: exact (exponent shift)
            s, c = jnp.sin(a), jnp.cos(a)     # polynomial sin/cos: the VALU cost
        elif mode == "pow2":
            # exact powers of two: double-angle recurrence, ~4 VALU muls
            # instead of 2 polynomial transcendentals per element.
            s, c = 2.0 * s * c, (c - s) * (c + s)
        else:
            # equally spaced freqs: angle-addition recurrence.
            s, c = s * cd + c * sd, c * cd - s * sd
        o_ref[1 + 2 * k, 0] = s.astype(o_ref.dtype)
        o_ref[2 + 2 * k, 0] = c.astype(o_ref.dtype)


# ----------------------------------------------------------------------------
# Tiling / VMEM helpers
# ----------------------------------------------------------------------------
def _vmem_capacity_bytes():
    try:
        return int(pltpu.get_tpu_info().vmem_capacity_bytes)
    except Exception:
        return 64 << 20                       # conservative: v7x per-TensorCore


def _choose_tiling(B, n_parts, in_item, out_item, vmem_budget):
    """Pick (W lanes, nR rows/channel, rb rows/block) for the (C, nR, W) view."""
    # Widest lane width that still gives >= 8 sublane rows per channel
    # (keeps every vreg fully dense); small inputs use a single 128-lane row.
    W = 128
    for cand in (1024, 512, 256):
        if B >= 8 * cand:
            W = cand
            break
    nR = -(-B // W)
    if nR < 8:
        rb = nR                               # block dim == full array dim: legal
    else:
        rb = 8
        # double-buffered in+out bytes per row of the block
        per_row = 2 * W * (in_item + n_parts * out_item)
        while rb * 2 <= min(64, nR) and rb * 2 * per_row <= vmem_budget:
            rb *= 2
    return W, nR, rb


# ----------------------------------------------------------------------------
# Public wrapper
# ----------------------------------------------------------------------------
def make_embedding(in_channels, N_freqs, logscale=True, out_dtype=None,
                   layout="torch", anchor_every=5):
    """Returns (embed_fn, out_channels).

    layout="torch": embed_fn(x:(B,C)) -> (B, C*(2*N_freqs+1)), PyTorch order.
    layout="cn":    embed_fn(x:(B,C)) -> (C*(2*N_freqs+1), B), kernel-native
                    channels-first order (zero post-kernel relayout; fold the
                    permutation into the consumer's first Linear weights).
    out_dtype: e.g. jnp.bfloat16 to halve HBM writeback (v5e is write-bound).
    """
    if logscale:
        freqs = tuple(float(2.0 ** k) for k in range(N_freqs))
        mode = "pow2"
    else:
        if N_freqs > 1:
            step = (2.0 ** (N_freqs - 1) - 1.0) / (N_freqs - 1)
            freqs = tuple(1.0 + k * step for k in range(N_freqs))
        else:
            freqs = (1.0,)
        mode = "linear"
    n_parts = 2 * N_freqs + 1
    out_channels = in_channels * n_parts

    kernel = functools.partial(_embedding_kernel, freqs=freqs, mode=mode,
                               anchor_every=max(1, int(anchor_every)))

    def embed(x):
        B, C = x.shape
        assert C == in_channels
        odtype = x.dtype if out_dtype is None else jnp.dtype(out_dtype)
        in_item = jnp.dtype(x.dtype).itemsize
        out_item = jnp.dtype(odtype).itemsize

        cap = _vmem_capacity_bytes()
        W, nR, rb = _choose_tiling(B, n_parts, in_item, out_item,
                                   vmem_budget=int(0.35 * cap))
        Bp = nR * W
        grid = (C, -(-nR // rb))              # >= C parallel steps (v7x 2-TC)

        # Channel-major lane-dense input view (C, nR, W).  Input-sized copy
        # only (n_parts times smaller than the output); pad batch up to a
        # multiple of W so the reshape is exact (fuses with this copy).
        xp = x if Bp == B else jnp.pad(x, ((0, Bp - B), (0, 0)))
        x3 = xp.T.reshape(C, nR, W)

        in_block = rb * W * in_item
        out_block = n_parts * rb * W * out_item
        vmem_limit = min(int(0.75 * cap),              # <= 48 MiB on v7x
                         2 * (in_block + out_block) + (4 << 20))

        out4 = pl.pallas_call(
            kernel,
            out_shape=jax.ShapeDtypeStruct((n_parts, C, nR, W), odtype),
            grid=grid,
            in_specs=[pl.BlockSpec((1, rb, W), lambda c, r: (c, r, 0))],
            out_specs=pl.BlockSpec((n_parts, 1, rb, W),
                                   lambda c, r: (0, c, r, 0)),
            compiler_params=pltpu.CompilerParams(
                dimension_semantics=("parallel", "parallel"),
                vmem_limit_bytes=int(vmem_limit)),
        )(x3)

        # Row-major, (n_parts, C, nR, W) IS the channels-first result: free
        # reshape, out_cn[p*C + c, i] = part_p(x[i, c]).
        out_cn = out4.reshape(n_parts * C, Bp)
        if Bp != B:
            out_cn = out_cn[:, :B]            # fuses into the transpose below
        if layout == "cn":
            return out_cn                     # zero extra HBM traffic
        # Single clean 2-D transpose to the exact PyTorch layout
        # (B, n_parts*C); contiguous reads along B, contiguous row writes.
        return out_cn.T

    return jax.jit(embed), out_channels


# ----------------------------------------------------------------------------
# Pure-JAX reference (matches the PyTorch forward exactly)
# ----------------------------------------------------------------------------
def embedding_ref(x, N_freqs, logscale=True):
    if logscale:
        freq_bands = 2.0 ** jnp.linspace(0.0, N_freqs - 1, N_freqs)
    else:
        freq_bands = jnp.linspace(1.0, 2.0 ** (N_freqs - 1), N_freqs)
    out = [x]
    for f in freq_bands:
        out.append(jnp.sin(f * x))
        out.append(jnp.cos(f * x))
    return jnp.concatenate(out, axis=-1)


# ----------------------------------------------------------------------------
# Self-test
# ----------------------------------------------------------------------------
if __name__ == "__main__":
    configs = [
        # (B, C, N_freqs, logscale, out_dtype, atol)
        (80,   3, 10, True,  None,         1e-4),   # NeRF xyz embedding, tiny B
        (1300, 3, 4,  True,  None,         1e-4),   # ragged last row-block
        (2048, 3, 6,  False, None,         1e-4),   # linear freqs (angle-addition)
        (256,  3, 10, True,  jnp.bfloat16, 2e-2),   # bf16 writeback (v5e-friendly)
    ]
    key = jax.random.PRNGKey(0)
    for (B, C, N, logscale, odt, atol) in configs:
        key, sub = jax.random.split(key)
        x = jax.random.uniform(sub, (B, C), jnp.float32, minval=-1.0, maxval=1.0)
        embed, out_c = make_embedding(C, N, logscale=logscale, out_dtype=odt)
        out = jax.block_until_ready(embed(x))
        ref = embedding_ref(x, N, logscale=logscale)
        assert out.shape == (B, out_c), (out.shape, (B, out_c))
        err = float(jnp.max(jnp.abs(out.astype(jnp.float32) - ref)))
        assert err <= atol, (
            f"mismatch B={B} C={C} N={N} logscale={logscale} "
            f"dtype={odt}: max err {err}")

    # Kernel-native channels-first layout (review option: fold the permutation
    # into the consumer, e.g. permute the first MLP layer's weight rows).
    B, C, N = 512, 3, 10
    key, sub = jax.random.split(key)
    x = jax.random.uniform(sub, (B, C), jnp.float32, minval=-1.0, maxval=1.0)
    embed_cn, out_c = make_embedding(C, N, layout="cn")
    out_cn = jax.block_until_ready(embed_cn(x))
    ref = embedding_ref(x, N, logscale=True)
    assert out_cn.shape == (out_c, B), out_cn.shape
    assert float(jnp.max(jnp.abs(out_cn - ref.T))) <= 1e-4

    print("KERNEL_OK")
</pallas_src>

<mosaic_0001>
module attributes {stable_mosaic.version = 11 : i64} {
  func.func @_embedding_kernel(%arg0: i32, %arg1: i32, %arg2: memref<1x1x128xf32, #tpu.memory_space<vmem>>, %arg3: memref<21x1x1x128xf32, #tpu.memory_space<vmem>>) attributes {dimension_semantics = [#tpu.dimension_semantics<parallel>, #tpu.dimension_semantics<parallel>], iteration_bounds = array<i64: 3, 1>, scalar_prefetch = 0 : i64, scratch_operands = 0 : i64, tpu.core_type = #tpu.core_type<tc>, window_params = [{transform_indices = @transform_0, window_bounds = array<i64: 1, 1, 128>}, {transform_indices = @transform_1, window_bounds = array<i64: 21, 1, 1, 128>}]} {
    %c0 = arith.constant 0 : index
    %c0_0 = arith.constant 0 : index
    %c0_1 = arith.constant 0 : index
    %0 = vector.load %arg2[%c0, %c0_0, %c0_1] : memref<1x1x128xf32, #tpu.memory_space<vmem>>, vector<1x1x128xf32>
    %1 = vector.shape_cast %0 : vector<1x1x128xf32> to vector<1x128xf32>
    %c0_2 = arith.constant 0 : index
    %c0_3 = arith.constant 0 : index
    %c0_4 = arith.constant 0 : index
    %c0_5 = arith.constant 0 : index
    %2 = vector.load %arg3[%c0_2, %c0_3, %c0_4, %c0_5] : memref<21x1x1x128xf32, #tpu.memory_space<vmem>>, vector<1x1x1x128xf32>
    %3 = vector.shape_cast %2 : vector<1x1x1x128xf32> to vector<1x128xf32>
    %4 = vector.shape_cast %1 : vector<1x128xf32> to vector<1x1x1x128xf32>
    tpu.vector_store %arg3[%c0_2, %c0_3, %c0_4, %c0_5], %4 {strides = array<i32>} : memref<21x1x1x128xf32, #tpu.memory_space<vmem>>, vector<1x1x1x128xf32>,
    %cst = arith.constant 1.000000e+00 : f32
    %5 = vector.broadcast %cst : f32 to vector<1x128xf32>
    %6 = arith.mulf %5, %1 : vector<1x128xf32>
    %7 = math.sin %6 : vector<1x128xf32>
    %8 = math.cos %6 : vector<1x128xf32>
    %c1 = arith.constant 1 : index
    %c0_6 = arith.constant 0 : index
    %c0_7 = arith.constant 0 : index
    %c0_8 = arith.constant 0 : index
    %9 = vector.load %arg3[%c1, %c0_6, %c0_7, %c0_8] : memref<21x1x1x128xf32, #tpu.memory_space<vmem>>, vector<1x1x1x128xf32>
    %10 = vector.shape_cast %9 : vector<1x1x1x128xf32> to vector<1x128xf32>
    %11 = vector.shape_cast %7 : vector<1x128xf32> to vector<1x1x1x128xf32>
    tpu.vector_store %arg3[%c1, %c0_6, %c0_7, %c0_8], %11 {strides = array<i32>} : memref<21x1x1x128xf32, #tpu.memory_space<vmem>>, vector<1x1x1x128xf32>,
    %c2 = arith.constant 2 : index
    %c0_9 = arith.constant 0 : index
    %c0_10 = arith.constant 0 : index
    %c0_11 = arith.constant 0 : index
    %12 = vector.load %arg3[%c2, %c0_9, %c0_10, %c0_11] : memref<21x1x1x128xf32, #tpu.memory_space<vmem>>, vector<1x1x1x128xf32>
    %13 = vector.shape_cast %12 : vector<1x1x1x128xf32> to vector<1x128xf32>
    %14 = vector.shape_cast %8 : vector<1x128xf32> to vector<1x1x1x128xf32>
    tpu.vector_store %arg3[%c2, %c0_9, %c0_10, %c0_11], %14 {strides = array<i32>} : memref<21x1x1x128xf32, #tpu.memory_space<vmem>>, vector<1x1x1x128xf32>,
    %cst_12 = arith.constant 2.000000e+00 : f32
    %15 = vector.broadcast %cst_12 : f32 to vector<1x128xf32>
    %16 = arith.mulf %15, %7 : vector<1x128xf32>
    %17 = arith.mulf %16, %8 : vector<1x128xf32>
    %18 = arith.subf %8, %7 : vector<1x128xf32>
    %19 = arith.addf %8, %7 : vector<1x128xf32>
    %20 = arith.mulf %18, %19 : vector<1x128xf32>
    %c3 = arith.constant 3 : index
    %c0_13 = arith.constant 0 : index
    %c0_14 = arith.constant 0 : index
    %c0_15 = arith.constant 0 : index
    %21 = vector.load %arg3[%c3, %c0_13, %c0_14, %c0_15] : memref<21x1x1x128xf32, #tpu.memory_space<vmem>>, vector<1x1x1x128xf32>
    %22 = vector.shape_cast %21 : vector<1x1x1x128xf32> to vector<1x128xf32>
    %23 = vector.shape_cast %17 : vector<1x128xf32> to vector<1x1x1x128xf32>
    tpu.vector_store %arg3[%c3, %c0_13, %c0_14, %c0_15], %23 {strides = array<i32>} : memref<21x1x1x128xf32, #tpu.memory_space<vmem>>, vector<1x1x1x128xf32>,
    %c4 = arith.constant 4 : index
    %c0_16 = arith.constant 0 : index
    %c0_17 = arith.constant 0 : index
    %c0_18 = arith.constant 0 : index
    %24 = vector.load %arg3[%c4, %c0_16, %c0_17, %c0_18] : memref<21x1x1x128xf32, #tpu.memory_space<vmem>>, vector<1x1x1x128xf32>
    %25 = vector.shape_cast %24 : vector<1x1x1x128xf32> to vector<1x128xf32>
    %26 = vector.shape_cast %20 : vector<1x128xf32> to vector<1x1x1x128xf32>
    tpu.vector_store %arg3[%c4, %c0_16, %c0_17, %c0_18], %26 {strides = array<i32>} : memref<21x1x1x128xf32, #tpu.memory_space<vmem>>, vector<1x1x1x128xf32>,
    %cst_19 = arith.constant 2.000000e+00 : f32
    %27 = vector.broadcast %cst_19 : f32 to vector<1x128xf32>
    %28 = arith.mulf %27, %17 : vector<1x128xf32>
    %29 = arith.mulf %28, %20 : vector<1x128xf32>
    %30 = arith.subf %20, %17 : vector<1x128xf32>
    %31 = arith.addf %20, %17 : vector<1x128xf32>
    %32 = arith.mulf %30, %31 : vector<1x128xf32>
    %c5 = arith.constant 5 : index
    %c0_20 = arith.constant 0 : index
    %c0_21 = arith.constant 0 : index
    %c0_22 = arith.constant 0 : index
    %33 = vector.load %arg3[%c5, %c0_20, %c0_21, %c0_22] : memref<21x1x1x128xf32, #tpu.memory_space<vmem>>, vector<1x1x1x128xf32>
    %34 = vector.shape_cast %33 : vector<1x1x1x128xf32> to vector<1x128xf32>
    %35 = vector.shape_cast %29 : vector<1x128xf32> to vector<1x1x1x128xf32>
    tpu.vector_store %arg3[%c5, %c0_20, %c0_21, %c0_22], %35 {strides = array<i32>} : memref<21x1x1x128xf32, #tpu.memory_space<vmem>>, vector<1x1x1x128xf32>,
    %c6 = arith.constant 6 : index
    %c0_23 = arith.constant 0 : index
    %c0_24 = arith.constant 0 : index
    %c0_25 = arith.constant 0 : index
    %36 = vector.load %arg3[%c6, %c0_23, %c0_24, %c0_25] : memref<21x1x1x128xf32, #tpu.memory_space<vmem>>, vector<1x1x1x128xf32>
    %37 = vector.shape_cast %36 : vector<1x1x1x128xf32> to vector<1x128xf32>
    %38 = vector.shape_cast %32 : vector<1x128xf32> to vector<1x1x1x128xf32>
    tpu.vector_store %arg3[%c6, %c0_23, %c0_24, %c0_25], %38 {strides = array<i32>} : memref<21x1x1x128xf32, #tpu.memory_space<vmem>>, vector<1x1x1x128xf32>,
    %cst_26 = arith.constant 2.000000e+00 : f32
    %39 = vector.broadcast %cst_26 : f32 to vector<1x128xf32>
    %40 = arith.mulf %39, %29 : vector<1x128xf32>
    %41 = arith.mulf %40, %32 : vector<1x128xf32>
    %42 = arith.subf %32, %29 : vector<1x128xf32>
    %43 = arith.addf %32, %29 : vector<1x128xf32>
    %44 = arith.mulf %42, %43 : vector<1x128xf32>
    %c7 = arith.constant 7 : index
    %c0_27 = arith.constant 0 : index
    %c0_28 = arith.constant 0 : index
    %c0_29 = arith.constant 0 : index
    %45 = vector.load %arg3[%c7, %c0_27, %c0_28, %c0_29] : memref<21x1x1x128xf32, #tpu.memory_space<vmem>>, vector<1x1x1x128xf32>
    %46 = vector.shape_cast %45 : vector<1x1x1x128xf32> to vector<1x128xf32>
    %47 = vector.shape_cast %41 : vector<1x128xf32> to vector<1x1x1x128xf32>
    tpu.vector_store %arg3[%c7, %c0_27, %c0_28, %c0_29], %47 {strides = array<i32>} : memref<21x1x1x128xf32, #tpu.memory_space<vmem>>, vector<1x1x1x128xf32>,
    %c8 = arith.constant 8 : index
    %c0_30 = arith.constant 0 : index
    %c0_31 = arith.constant 0 : index
    %c0_32 = arith.constant 0 : index
    %48 = vector.load %arg3[%c8, %c0_30, %c0_31, %c0_32] : memref<21x1x1x128xf32, #tpu.memory_space<vmem>>, vector<1x1x1x128xf32>
    %49 = vector.shape_cast %48 : vector<1x1x1x128xf32> to vector<1x128xf32>
    %50 = vector.shape_cast %44 : vector<1x128xf32> to vector<1x1x1x128xf32>
    tpu.vector_store %arg3[%c8, %c0_30, %c0_31, %c0_32], %50 {strides = array<i32>} : memref<21x1x1x128xf32, #tpu.memory_space<vmem>>, vector<1x1x1x128xf32>,
    %cst_33 = arith.constant 2.000000e+00 : f32
    %51 = vector.broadcast %cst_33 : f32 to vector<1x128xf32>
    %52 = arith.mulf %51, %41 : vector<1x128xf32>
    %53 = arith.mulf %52, %44 : vector<1x128xf32>
    %54 = arith.subf %44, %41 : vector<1x128xf32>
    %55 = arith.addf %44, %41 : vector<1x128xf32>
    %56 = arith.mulf %54, %55 : vector<1x128xf32>
    %c9 = arith.constant 9 : index
    %c0_34 = arith.constant 0 : index
    %c0_35 = arith.constant 0 : index
    %c0_36 = arith.constant 0 : index
    %57 = vector.load %arg3[%c9, %c0_34, %c0_35, %c0_36] : memref<21x1x1x128xf32, #tpu.memory_space<vmem>>, vector<1x1x1x128xf32>
    %58 = vector.shape_cast %57 : vector<1x1x1x128xf32> to vector<1x128xf32>
    %59 = vector.shape_cast %53 : vector<1x128xf32> to vector<1x1x1x128xf32>
    tpu.vector_store %arg3[%c9, %c0_34, %c0_35, %c0_36], %59 {strides = array<i32>} : memref<21x1x1x128xf32, #tpu.memory_space<vmem>>, vector<1x1x1x128xf32>,
    %c10 = arith.constant 10 : index
    %c0_37 = arith.constant 0 : index
    %c0_38 = arith.constant 0 : index
    %c0_39 = arith.constant 0 : index
    %60 = vector.load %arg3[%c10, %c0_37, %c0_38, %c0_39] : memref<21x1x1x128xf32, #tpu.memory_space<vmem>>, vector<1x1x1x128xf32>
    %61 = vector.shape_cast %60 : vector<1x1x1x128xf32> to vector<1x128xf32>
    %62 = vector.shape_cast %56 : vector<1x128xf32> to vector<1x1x1x128xf32>
    tpu.vector_store %arg3[%c10, %c0_37, %c0_38, %c0_39], %62 {strides = array<i32>} : memref<21x1x1x128xf32, #tpu.memory_space<vmem>>, vector<1x1x1x128xf32>,
    %cst_40 = arith.constant 3.200000e+01 : f32
    %63 = vector.broadcast %cst_40 : f32 to vector<1x128xf32>
    %64 = arith.mulf %63, %1 : vector<1x128xf32>
    %65 = math.sin %64 : vector<1x128xf32>
    %66 = math.cos %64 : vector<1x128xf32>
    %c11 = arith.constant 11 : index
    %c0_41 = arith.constant 0 : index
    %c0_42 = arith.constant 0 : index
    %c0_43 = arith.constant 0 : index
    %67 = vector.load %arg3[%c11, %c0_41, %c0_42, %c0_43] : memref<21x1x1x128xf32, #tpu.memory_space<vmem>>, vector<1x1x1x128xf32>
    %68 = vector.shape_cast %67 : vector<1x1x1x128xf32> to vector<1x128xf32>
    %69 = vector.shape_cast %65 : vector<1x128xf32> to vector<1x1x1x128xf32>
    tpu.vector_store %arg3[%c11, %c0_41, %c0_42, %c0_43], %69 {strides = array<i32>} : memref<21x1x1x128xf32, #tpu.memory_space<vmem>>, vector<1x1x1x128xf32>,
    %c12 = arith.constant 12 : index
    %c0_44 = arith.constant 0 : index
    %c0_45 = arith.constant 0 : index
    %c0_46 = arith.constant 0 : index
    %70 = vector.load %arg3[%c12, %c0_44, %c0_45, %c0_46] : memref<21x1x1x128xf32, #tpu.memory_space<vmem>>, vector<1x1x1x128xf32>
    %71 = vector.shape_cast %70 : vector<1x1x1x128xf32> to vector<1x128xf32>
    %72 = vector.shape_cast %66 : vector<1x128xf32> to vector<1x1x1x128xf32>
    tpu.vector_store %arg3[%c12, %c0_44, %c0_45, %c0_46], %72 {strides = array<i32>} : memref<21x1x1x128xf32, #tpu.memory_space<vmem>>, vector<1x1x1x128xf32>,
    %cst_47 = arith.constant 2.000000e+00 : f32
    %73 = vector.broadcast %cst_47 : f32 to vector<1x128xf32>
    %74 = arith.mulf %73, %65 : vector<1x128xf32>
    %75 = arith.mulf %74, %66 : vector<1x128xf32>
    %76 = arith.subf %66, %65 : vector<1x128xf32>
    %77 = arith.addf %66, %65 : vector<1x128xf32>
    %78 = arith.mulf %76, %77 : vector<1x128xf32>
    %c13 = arith.constant 13 : index
    %c0_48 = arith.constant 0 : index
    %c0_49 = arith.constant 0 : index
    %c0_50 = arith.constant 0 : index
    %79 = vector.load %arg3[%c13, %c0_48, %c0_49, %c0_50] : memref<21x1x1x128xf32, #tpu.memory_space<vmem>>, vector<1x1x1x128xf32>
    %80 = vector.shape_cast %79 : vector<1x1x1x128xf32> to vector<1x128xf32>
    %81 = vector.shape_cast %75 : vector<1x128xf32> to vector<1x1x1x128xf32>
    tpu.vector_store %arg3[%c13, %c0_48, %c0_49, %c0_50], %81 {strides = array<i32>} : memref<21x1x1x128xf32, #tpu.memory_space<vmem>>, vector<1x1x1x128xf32>,
    %c14 = arith.constant 14 : index
    %c0_51 = arith.constant 0 : index
    %c0_52 = arith.constant 0 : index
    %c0_53 = arith.constant 0 : index
    %82 = vector.load %arg3[%c14, %c0_51, %c0_52, %c0_53] : memref<21x1x1x128xf32, #tpu.memory_space<vmem>>, vector<1x1x1x128xf32>
    %83 = vector.shape_cast %82 : vector<1x1x1x128xf32> to vector<1x128xf32>
    %84 = vector.shape_cast %78 : vector<1x128xf32> to vector<1x1x1x128xf32>
    tpu.vector_store %arg3[%c14, %c0_51, %c0_52, %c0_53], %84 {strides = array<i32>} : memref<21x1x1x128xf32, #tpu.memory_space<vmem>>, vector<1x1x1x128xf32>,
    %cst_54 = arith.constant 2.000000e+00 : f32
    %85 = vector.broadcast %cst_54 : f32 to vector<1x128xf32>
    %86 = arith.mulf %85, %75 : vector<1x128xf32>
    %87 = arith.mulf %86, %78 : vector<1x128xf32>
    %88 = arith.subf %78, %75 : vector<1x128xf32>
    %89 = arith.addf %78, %75 : vector<1x128xf32>
    %90 = arith.mulf %88, %89 : vector<1x128xf32>
    %c15 = arith.constant 15 : index
    %c0_55 = arith.constant 0 : index
    %c0_56 = arith.constant 0 : index
    %c0_57 = arith.constant 0 : index
    %91 = vector.load %arg3[%c15, %c0_55, %c0_56, %c0_57] : memref<21x1x1x128xf32, #tpu.memory_space<vmem>>, vector<1x1x1x128xf32>
    %92 = vector.shape_cast %91 : vector<1x1x1x128xf32> to vector<1x128xf32>
    %93 = vector.shape_cast %87 : vector<1x128xf32> to vector<1x1x1x128xf32>
    tpu.vector_store %arg3[%c15, %c0_55, %c0_56, %c0_57], %93 {strides = array<i32>} : memref<21x1x1x128xf32, #tpu.memory_space<vmem>>, vector<1x1x1x128xf32>,
    %c16 = arith.constant 16 : index
    %c0_58 = arith.constant 0 : index
    %c0_59 = arith.constant 0 : index
    %c0_60 = arith.constant 0 : index
    %94 = vector.load %arg3[%c16, %c0_58, %c0_59, %c0_60] : memref<21x1x1x128xf32, #tpu.memory_space<vmem>>, vector<1x1x1x128xf32>
    %95 = vector.shape_cast %94 : vector<1x1x1x128xf32> to vector<1x128xf32>
    %96 = vector.shape_cast %90 : vector<1x128xf32> to vector<1x1x1x128xf32>
    tpu.vector_store %arg3[%c16, %c0_58, %c0_59, %c0_60], %96 {strides = array<i32>} : memref<21x1x1x128xf32, #tpu.memory_space<vmem>>, vector<1x1x1x128xf32>,
    %cst_61 = arith.constant 2.000000e+00 : f32
    %97 = vector.broadcast %cst_61 : f32 to vector<1x128xf32>
    %98 = arith.mulf %97, %87 : vector<1x128xf32>
    %99 = arith.mulf %98, %90 : vector<1x128xf32>
    %100 = arith.subf %90, %87 : vector<1x128xf32>
    %101 = arith.addf %90, %87 : vector<1x128xf32>
    %102 = arith.mulf %100, %101 : vector<1x128xf32>
    %c17 = arith.constant 17 : index
    %c0_62 = arith.constant 0 : index
    %c0_63 = arith.constant 0 : index
    %c0_64 = arith.constant 0 : index
    %103 = vector.load %arg3[%c17, %c0_62, %c0_63, %c0_64] : memref<21x1x1x128xf32, #tpu.memory_space<vmem>>, vector<1x1x1x128xf32>
    %104 = vector.shape_cast %103 : vector<1x1x1x128xf32> to vector<1x128xf32>
    %105 = vector.shape_cast %99 : vector<1x128xf32> to vector<1x1x1x128xf32>
    tpu.vector_store %arg3[%c17, %c0_62, %c0_63, %c0_64], %105 {strides = array<i32>} : memref<21x1x1x128xf32, #tpu.memory_space<vmem>>, vector<1x1x1x128xf32>,
    %c18 = arith.constant 18 : index
    %c0_65 = arith.constant 0 : index
    %c0_66 = arith.constant 0 : index
    %c0_67 = arith.constant 0 : index
    %106 = vector.load %arg3[%c18, %c0_65, %c0_66, %c0_67] : memref<21x1x1x128xf32, #tpu.memory_space<vmem>>, vector<1x1x1x128xf32>
    %107 = vector.shape_cast %106 : vector<1x1x1x128xf32> to vector<1x128xf32>
    %108 = vector.shape_cast %102 : vector<1x128xf32> to vector<1x1x1x128xf32>
    tpu.vector_store %arg3[%c18, %c0_65, %c0_66, %c0_67], %108 {strides = array<i32>} : memref<21x1x1x128xf32, #tpu.memory_space<vmem>>, vector<1x1x1x128xf32>,
    %cst_68 = arith.constant 2.000000e+00 : f32
    %109 = vector.broadcast %cst_68 : f32 to vector<1x128xf32>
    %110 = arith.mulf %109, %99 : vector<1x128xf32>
    %111 = arith.mulf %110, %102 : vector<1x128xf32>
    %112 = arith.subf %102, %99 : vector<1x128xf32>
    %113 = arith.addf %102, %99 : vector<1x128xf32>
    %114 = arith.mulf %112, %113 : vector<1x128xf32>
    %c19 = arith.constant 19 : index
    %c0_69 = arith.constant 0 : index
    %c0_70 = arith.constant 0 : index
    %c0_71 = arith.constant 0 : index
    %115 = vector.load %arg3[%c19, %c0_69, %c0_70, %c0_71] : memref<21x1x1x128xf32, #tpu.memory_space<vmem>>, vector<1x1x1x128xf32>
    %116 = vector.shape_cast %115 : vector<1x1x1x128xf32> to vector<1x128xf32>
    %117 = vector.shape_cast %111 : vector<1x128xf32> to vector<1x1x1x128xf32>
    tpu.vector_store %arg3[%c19, %c0_69, %c0_70, %c0_71], %117 {strides = array<i32>} : memref<21x1x1x128xf32, #tpu.memory_space<vmem>>, vector<1x1x1x128xf32>,
    %c20 = arith.constant 20 : index
    %c0_72 = arith.constant 0 : index
    %c0_73 = arith.constant 0 : index
    %c0_74 = arith.constant 0 : index
    %118 = vector.load %arg3[%c20, %c0_72, %c0_73, %c0_74] : memref<21x1x1x128xf32, #tpu.memory_space<vmem>>, vector<1x1x1x128xf32>
    %119 = vector.shape_cast %118 : vector<1x1x1x128xf32> to vector<1x128xf32>
    %120 = vector.shape_cast %114 : vector<1x128xf32> to vector<1x1x1x128xf32>
    tpu.vector_store %arg3[%c20, %c0_72, %c0_73, %c0_74], %120 {strides = array<i32>} : memref<21x1x1x128xf32, #tpu.memory_space<vmem>>, vector<1x1x1x128xf32>,
    return
  }
  func.func @transform_0(%arg0: i32, %arg1: i32) -> (i32, i32, i32) {
    %c0_i32 = arith.constant 0 : i32
    %c0_i32_0 = arith.constant 0 : i32
    return %arg0, %arg1, %c0_i32 : i32, i32, i32
  }
  func.func @transform_1(%arg0: i32, %arg1: i32) -> (i32, i32, i32, i32) {
    %c0_i32 = arith.constant 0 : i32
    %c0_i32_0 = arith.constant 0 : i32
    %c0_i32_1 = arith.constant 0 : i32
    return %c0_i32, %arg0, %arg1, %c0_i32_0 : i32, i32, i32, i32
  }
}

</mosaic_0001>

<bundles_post_ra>
// kernel: embed.1
= control target key start
LH: loop header
LB: loop body
LE: loop exit
PB: predicated region body
PF: predicated region fallthrough
CT: control target
= control target key end

     0   :  { %s976_s6 = smov 0   ;;  %s978_s7 = smov 0   ;;  %s1186_s0 = inlined_call_operand.vmem [shape: f32[3,1,128], index: 0, kind: input, shape index: {}]   ;;  %s1187_s1 = inlined_call_operand.vmem [shape: f32[21,3,1,128], index: 1, kind: output, shape index: {}]  }
   0x1   :  { %s980_s8 = smov 0   ;;  %s982_s9 = smov 0  }
   0x2   :  { %s984_s10 = smov 0  }
   0x3 LB: > { %s814_s11 = sadd.s32 4294967295, %s958_s10   ;;  %s23_s12 = sadd.s32 1, %s954_s9  ;;  %s958_s10 = sphi %s984_s10, %s11_s10   ;;  %s954_s9 = sphi %s982_s9, %s1192_s9   ;;  %s950_s8 = sphi %s980_s8, %s1191_s8   ;;  %s946_s7 = sphi %s978_s7, %s1190_s7   ;;  %s942_s6 = sphi %s976_s6, %s1189_s6  }
   0x4   : > { %p25_p0 = scmp.ge.s32.totalorder %s23_s12, 3  ;;  %s60_s13 = sadd.s32 1, %s946_s7 }
   0x5   : > { %p70_p1 = scmp.ne.s32.totalorder %s946_s7, %s942_s6  ;;  %p71_p2 = scmp.eq.s32.totalorder %s814_s11, 2 }
   0x6   : > { %s1194_s12 = smov (%p25_p0, %s23_s12), 0  ;;  %p818_p4 = scmp.ge.s32.totalorder %s958_s10, 1 }
   0x7   : > { %p1005_p3 = por %p71_p2, %p70_p1  ;;  %s55_s15 = ssub.s32 %s954_s9, %s1194_s12 }
   0x8   : > { %p104_p5 = scmp.lt.s32.totalorder %s958_s10, 4  ;;  %p58_p6 = scmp.eq.s32.totalorder %s55_s15, 0 }
   0xa   : > { %p105_p7 = pnand %p818_p4, %p104_p5 }
   0xb   : > { %s1014_s16 = scalar_select %p58_p6, %s946_s7, %s60_s13  }
   0xc   : > { %108 = sbr.rel (%p105_p7) target bundleno = 139 (0x8b), region = 24  ;;  %s121_s17 = sand.u32 (!%p105_p7), 1, %s942_s6   ;;  %v960_v21 = vmov (!%p105_p7), 683565275   ;;  %v961_v23 = vmov (!%p105_p7), 2475754826  }
   0xd   : > { %p124_p8 = scmp.lt.s32.totalorder (!%p105_p7), %s950_s8, 2  ;;  %s857_s18 = smul.u32 (!%p105_p7), 21, %s121_s17  ;;  %v962_v25 = vmov (!%p105_p7), 2131351028   ;;  %v963_v27 = vmov (!%p105_p7), 2102212464  }
   0xe   : > { %v964_v29 = vmov (!%p105_p7), 920167782   ;;  %v965_v36 = vmov (!%p105_p7), 1326507024  }
   0xf   : > { %s1023_s23 = scalar_lea.vmem (!%p105_p7), [#allocation2], %s857_s18 }
  0x13   : > { %s125_s19 = scalar_select %p124_p8, %s950_s8, 2 }
  0x14   : > { %s1127_s26 = scalar_lea.vmem (%p1005_p3), %s1187_s1, %s950_s8 }
  0x15   : > { %s129_s22 = scalar_lea.vmem %s1186_s0, %s125_s19 }
  0x16   : > { %v1021_v0 = vld [vmem:[%s129_s22] sm:$0x1] }
  0x17   : > { %131 = vst [vmem:[%s1023_s23] sm:$0x1] %v1021_v0  ;;  %v135_v1 = vand.u32 2139095040, %v1021_v0  ;;  %v132_v2 = vand.u32 2147483647, %v1021_v0  ;;  %v1030_v3 = vmul.f32 32.0, %v1021_v0  ;;  %vm134_vm14 = vcmp.lt.s32.totalorder %v1021_v0, 0 }
  0x19   : > { %v136_v4 = vshrl.u32 %v135_v1, 23  ;;  %v139_v5 = vand.u32 8388607, %v132_v2  ;;  %v380_v6 = vand.u32 2147483647, %v1030_v3  ;;  %v383_v7 = vand.u32 2139095040, %v1030_v3 }
  0x1a   : > { %vm133_vm15 = vcmp.le.f32.partialorder %v132_v2, 0.7853982 }
  0x1b   : > { %v819_v8 = vadd.s32 4294967169, %v136_v4  ;;  %v384_v9 = vshrl.u32 %v383_v7, 23  ;;  %v140_v11 = vor.u32 8388608, %v139_v5  ;;  %v1038_v13 = vand.u32 8388607, %v380_v6 }
  0x1d   : > { %v142_v10 = vadd.s32 1, %v819_v8  ;;  %v837_v12 = vadd.s32 4294967169, %v384_v9  ;;  %v1040_v18 = vshll.u32 %v140_v11, 8  ;;  %v388_v19 = vor.u32 8388608, %v1038_v13 }
  0x1f   : > { %vm143_vm0 = vcmp.gt.s32.totalorder %v142_v10, 0  ;;  %v390_v15 = vadd.s32 1, %v837_v12 }
  0x20   : > { %v144_v14 = vsel %vm143_vm0, %v142_v10, 0  ;;  %vm382_vm0 = vcmp.lt.s32.totalorder %v1030_v3, 0 }
  0x21   : > { %v145_v16 = vshrl.u32 %v144_v14, 5  ;;  %v146_v17 = vand.u32 31, %v144_v14  ;;  %vm391_vm1 = vcmp.gt.s32.totalorder %v390_v15, 0 }
  0x22   : > { %v392_v41 = vsel %vm391_vm1, %v390_v15, 0  ;;  %vm381_vm1 = vcmp.le.f32.partialorder %v380_v6, 0.7853982 }
  0x23   : > { %v147_v20 = vsub.s32 32, %v146_v17  ;;  %v149_v22 = vshll.u32 %v960_v21, %v146_v17  ;;  %v152_v24 = vshll.u32 %v961_v23, %v146_v17  ;;  %v155_v26 = vshll.u32 %v962_v25, %v146_v17 }
  0x24   : > { %v158_v28 = vshll.u32 %v963_v27, %v146_v17  ;;  %v161_v30 = vshll.u32 %v964_v29, %v146_v17  ;;  %vm164_vm2 = vcmp.lt.s32.totalorder %v145_v16, 1  ;;  %vm165_vm3 = vcmp.lt.s32.totalorder %v145_v16, 2 }
  0x25   : > { %v148_v31 = vshrl.u32 %v960_v21, %v147_v20  ;;  %v150_v32 = vshrl.u32 %v961_v23, %v147_v20  ;;  %v153_v33 = vshrl.u32 %v962_v25, %v147_v20  ;;  %v156_v34 = vshrl.u32 %v963_v27, %v147_v20 }
  0x26   : > { %v159_v35 = vshrl.u32 %v964_v29, %v147_v20  ;;  %v162_v37 = vshrl.u32 %v965_v36, %v147_v20  ;;  %vm166_vm4 = vcmp.lt.s32.totalorder %v145_v16, 3  ;;  %vm167_vm5 = vcmp.lt.s32.totalorder %v145_v16, 4 }
  0x27   : > { %v151_v38 = vor.u32 %v150_v32, %v149_v22  ;;  %v154_v39 = vor.u32 %v153_v33, %v152_v24  ;;  %v157_v40 = vor.u32 %v156_v34, %v155_v26  ;;  %v393_v44 = vshrl.u32 %v392_v41, 5 }
  0x28   : > { %v160_v42 = vor.u32 %v159_v35, %v158_v28  ;;  %v163_v43 = vor.u32 %v162_v37, %v161_v30  ;;  %v394_v45 = vand.u32 31, %v392_v41 }
  0x29   : > { %v168_v46 = vsel %vm164_vm2, %v148_v31, %v151_v38  ;;  %v169_v47 = vsel %vm167_vm5, %v157_v40, 2102212464  ;;  %v172_v48 = vsel %vm164_vm2, %v151_v38, %v154_v39  ;;  %v176_v49 = vsel %vm164_vm2, %v154_v39, %v157_v40 }
  0x2a   : > { %v170_v50 = vsel %vm166_vm4, %v154_v39, %v169_v47  ;;  %v173_v51 = vsel %vm167_vm5, %v160_v42, 920167782  ;;  %v177_v52 = vsel %vm167_vm5, %v163_v43, 1326507024  ;;  %v395_v53 = vsub.s32 32, %v394_v45 }
  0x2b   : > { %v171_v54 = vsel %vm165_vm3, %v168_v46, %v170_v50  ;;  %v174_v55 = vsel %vm166_vm4, %v157_v40, %v173_v51  ;;  %v178_v56 = vsel %vm166_vm4, %v160_v42, %v177_v52  ;;  %v397_v57 = vshll.u32 %v960_v21, %v394_v45 }
  0x2c   : > { %v175_v58 = vsel %vm165_vm3, %v172_v48, %v174_v55  ;;  %v179_v59 = vsel %vm165_vm3, %v176_v49, %v178_v56  ;;  %v187_v60 = vmul.u32 %v1040_v18, %v171_v54  ;;  %v396_v61 = vshrl.u32 %v960_v21, %v395_v53 }
  0x2d   : > { %v1055_v62 = vmul.u32.u64.low %v1040_v18, %v179_v59  ;;  %v1056_v63 = vmul.u32.u64.high %v1040_v18, %v179_v59, %v1055_v62  ;;  %v1059_v1 = vmul.u32.u64.low %v1040_v18, %v175_v58  ;;  %v1060_v4 = vmul.u32.u64.high %v1040_v18, %v175_v58, %v1059_v1 }
  0x2e   : > { %v398_v5 = vshrl.u32 %v961_v23, %v395_v53  ;;  %v400_v7 = vshll.u32 %v961_v23, %v394_v45  ;;  %v401_v8 = vshrl.u32 %v962_v25, %v395_v53  ;;  %v403_v9 = vshll.u32 %v962_v25, %v394_v45 }
  0x2f   : > { %v404_v10 = vshrl.u32 %v963_v27, %v395_v53  ;;  %v406_v11 = vshll.u32 %v963_v27, %v394_v45  ;;  %v407_v12 = vshrl.u32 %v964_v29, %v395_v53  ;;  %v409_v14 = vshll.u32 %v964_v29, %v394_v45 }
  0x30   : > { %v399_v15 = vor.u32 %v398_v5, %v397_v57  ;;  %v402_v16 = vor.u32 %v401_v8, %v400_v7  ;;  %v410_v17 = vshrl.u32 %v965_v36, %v395_v53  ;;  %vm412_vm6 = vcmp.lt.s32.totalorder %v393_v44, 1 }
  0x31   : > { %vm189_vm7 = vc.u32 %v1056_v63, %v1059_v1  ;;  %v190_v20 = vadd.s32 1, %v1060_v4  ;;  %v405_v21 = vor.u32 %v404_v10, %v403_v9  ;;  %v428_v18 = vshll.u32 %v388_v19, 8 }
  0x32   : > { %v408_v22 = vor.u32 %v407_v12, %v406_v11  ;;  %v411_v23 = vor.u32 %v410_v17, %v409_v14  ;;  %vm413_vm8 = vcmp.lt.s32.totalorder %v393_v44, 2  ;;  %vm414_vm9 = vcmp.lt.s32.totalorder %v393_v44, 3 }
  0x33   : > { %v191_v24 = vsel %vm189_vm7, %v190_v20, %v1060_v4  ;;  %vm415_vm10 = vcmp.lt.s32.totalorder %v393_v44, 4  ;;  %v416_v25 = vsel %vm412_vm6, %v396_v61, %v399_v15  ;;  %v420_v26 = vsel %vm412_vm6, %v399_v15, %v402_v16 }
  0x34   : > { %v192_v27 = vadd.s32 %v191_v24, %v187_v60  ;;  %v417_v28 = vsel %vm415_vm10, %v405_v21, 2102212464  ;;  %v421_v29 = vsel %vm415_vm10, %v408_v22, 920167782  ;;  %v424_v30 = vsel %vm412_vm6, %v402_v16, %v405_v21 }
  0x35   : > { %v418_v31 = vsel %vm414_vm9, %v402_v16, %v417_v28  ;;  %v422_v32 = vsel %vm414_vm9, %v405_v21, %v421_v29  ;;  %v425_v13 = vsel %vm415_vm10, %v411_v23, 1326507024  ;;  %v188_v55 = vadd.s32 %v1059_v1, %v1056_v63 }
  0x36   : > { %v193_v19 = vadd.s32 536870912, %v192_v27  ;;  %v423_v33 = vsel %vm413_vm8, %v420_v26, %v422_v32  ;;  %v426_v34 = vsel %vm414_vm9, %v408_v22, %v425_v13  ;;  %v419_v35 = vsel %vm413_vm8, %v416_v25, %v418_v31 }
  0x37   : > { %v427_v36 = vsel %vm413_vm8, %v424_v30, %v426_v34  ;;  %v1073_v37 = vmul.u32.u64.low %v428_v18, %v423_v33  ;;  %v1074_v38 = vmul.u32.u64.high %v428_v18, %v423_v33, %v1073_v37  ;;  %v435_v43 = vmul.u32 %v428_v18, %v419_v35 }
  0x38   : > { %v194_v39 = vshrl.u32 %v193_v19, 30  ;;  %v1076_v40 = vmul.u32.u64.low %v428_v18, %v427_v36  ;;  %v1077_v41 = vmul.u32.u64.high %v428_v18, %v427_v36, %v1076_v40  ;;  %vm224_vm8 = vweird.f32 %v1021_v0 }
  0x39   : > { %v438_v45 = vadd.s32 1, %v1074_v38 }
  0x3a   : > { %v195_v42 = vshll.u32 %v194_v39, 30  ;;  %vm437_vm11 = vc.u32 %v1077_v41, %v1073_v37  ;;  %v218_v15 = vsub.s32 4, %v194_v39  ;;  %v436_v63 = vadd.s32 %v1073_v37, %v1077_v41 }
  0x3b   : > { %v439_v47 = vsel %vm437_vm11, %v438_v45, %v1074_v38 }
  0x3c   : > { %v196_v46 = vsub.s32 %v192_v27, %v195_v42  ;;  %v440_v49 = vadd.s32 %v439_v47, %v435_v43  ;;  %v219_v22 = vsel %vm134_vm14, %v218_v15, %v194_v39 }
  0x3d   : > { %v221_v27 = vsel %vm133_vm15, 0, %v219_v22 }
  0x3e   : > { %v198_v48 = vsub.s32 0, %v196_v46  ;;  %v441_v50 = vadd.s32 536870912, %v440_v49  ;;  %v225_v32 = vadd.s32 3, %v221_v27  ;;  %v329_v2 = vand.u32 3, %v221_v27 }
  0x40   : > { %v820_v44 = vmin.u32 %v198_v48, %v196_v46  ;;  %v442_v52 = vshrl.u32 %v441_v50, 30  ;;  %v226_v34 = vand.u32 3, %v225_v32  ;;  %vm334_vm3 = vcmp.eq.s32.totalorder %v329_v2, 2 }
  0x41   : > { %vm331_vm5 = vcmp.eq.s32.totalorder %v329_v2, 0  ;;  %vm330_vm7 = vcmp.lt.s32.totalorder %v329_v2, 2 }
  0x42   : > { %v200_v51 = vclz %v820_v44  ;;  %v443_v54 = vshll.u32 %v442_v52, 30  ;;  %v466_v19 = vsub.s32 4, %v442_v52  ;;  %vm231_vm2 = vcmp.eq.s32.totalorder %v226_v34, 2 }
  0x43   : > { %vm228_vm4 = vcmp.eq.s32.totalorder %v226_v34, 0  ;;  %vm227_vm6 = vcmp.lt.s32.totalorder %v226_v34, 2 }
  0x44   : > { %v821_v53 = vadd.s32 4294967294, %v200_v51  ;;  %v444_v57 = vsub.s32 %v440_v49, %v443_v54  ;;  %v467_v36 = vsel %vm382_vm0, %v466_v19, %v442_v52 }
  0x45   : > { %v469_v40 = vsel %vm381_vm1, 0, %v467_v36 }
  0x46   : > { %vm822_vm12 = vcmp.lt.s32.totalorder %v821_v53, 0  ;;  %v446_v61 = vsub.s32 0, %v444_v57  ;;  %v577_v52 = vand.u32 3, %v469_v40 }
  0x47   : > { %v203_v56 = vsel %vm822_vm12, 0, %v821_v53 }
  0x48   : > { %v204_v58 = vsub.s32 32, %v203_v56  ;;  %v205_v59 = vshll.u32 %v196_v46, %v203_v56  ;;  %v208_v60 = vsub.s32 4294967266, %v203_v56  ;;  %v838_v5 = vmin.u32 %v446_v61, %v444_v57 }
  0x49   : > { %v473_v46 = vadd.s32 3, %v469_v40  ;;  %vm582_vm9 = vcmp.eq.s32.totalorder %v577_v52, 2  ;;  %vm579_vm12 = vcmp.eq.s32.totalorder %v577_v52, 0 }
  0x4a   : > { %v206_v62 = vshrl.u32 %v188_v55, %v204_v58  ;;  %v209_v4 = vadd.s32 127, %v208_v60  ;;  %v448_v9 = vclz %v838_v5 }
  0x4b   : > { %v474_v56 = vand.u32 3, %v473_v46 }
  0x4c   : > { %v207_v7 = vor.u32 %v206_v62, %v205_v59  ;;  %v210_v8 = vshll.u32 %v209_v4, 23  ;;  %v839_v12 = vadd.s32 4294967294, %v448_v9 }
  0x4d   : > { %vm479_vm10 = vcmp.eq.s32.totalorder %v474_v56, 2  ;;  %vm476_vm11 = vcmp.eq.s32.totalorder %v474_v56, 0 }
  0x4e   : > { %v211_v10 = vor.u32 4788187, %v210_v8  ;;  %v214_v11 = vcvt.s32.f32 %v207_v7  ;;  %vm840_vm13 = vcmp.lt.s32.totalorder %v839_v12, 0 }
  0x4f   : > { %v451_v16 = vsel %vm840_vm13, 0, %v839_v12  ;;  %vm475_vm13 = vcmp.lt.s32.totalorder %v474_v56, 2 }
  0x50   : > { %v212_v14 = vand.u32 2147483647, %v211_v10  ;;  %v452_v17 = vsub.s32 32, %v451_v16  ;;  %v453_v20 = vshll.u32 %v444_v57, %v451_v16  ;;  %v456_v21 = vsub.s32 4294967266, %v451_v16 }
  0x52   : > { %v215_v1 = vmul.f32 %v214_v11, %v212_v14  ;;  %v454_v23 = vshrl.u32 %v436_v63, %v452_v17  ;;  %v457_v24 = vadd.s32 127, %v456_v21 }
  0x54   : > { %v216_v18 = vxor.u32 2147483648, %v215_v1  ;;  %v455_v28 = vor.u32 %v454_v23, %v453_v20  ;;  %v458_v29 = vshll.u32 %v457_v24, 23 }
  0x56   : > { %v217_v25 = vsel %vm134_vm14, %v216_v18, %v215_v1  ;;  %v459_v30 = vor.u32 4788187, %v458_v29  ;;  %v462_v31 = vcvt.s32.f32 %v455_v28  ;;  %vm472_vm14 = vweird.f32 %v1030_v3 }
  0x57   : > { %v220_v26 = vsel %vm133_vm15, %v1021_v0, %v217_v25  ;;  %vm578_vm15 = vcmp.lt.s32.totalorder %v577_v52, 2 }
  0x58   : > { %912 = vcosq.f32 %v220_v26  ;;  %v460_v13 = vand.u32 2147483647, %v459_v30 }
  0x59   : > { %914 = vsinq.f32 %v220_v26 }
  0x5a   : > { %v463_v33 = vmul.f32 %v462_v31, %v460_v13 }
  0x5c   : > { %v464_v35 = vxor.u32 2147483648, %v463_v33 }
  0x5e   : > { %v465_v37 = vsel %vm382_vm0, %v464_v35, %v463_v33 }
  0x5f   : > { %v468_v39 = vsel %vm381_vm1, %v1030_v3, %v465_v37 }
  0x60   : > { %916 = vcosq.f32 %v468_v39 }
  0x61   : > { %918 = vsinq.f32 %v468_v39 }
  0x62   : > { %v913_v38 = vpop.eup %912 }
  0x63   : > { %v915_v41 = vpop.eup %914  ;;  %v232_v42 = vxor.u32 2147483648, %v913_v38 }
  0x64   : > { %v229_v43 = vxor.u32 2147483648, %v915_v41 }
  0x65   : > { %v233_v6 = vsel %vm231_vm2, %v232_v42, %v915_v41  ;;  %v336_v45 = vsel %vm334_vm3, %v232_v42, %v915_v41 }
  0x66   : > { %v230_v47 = vsel %vm228_vm4, %v913_v38, %v229_v43  ;;  %v333_v48 = vsel %vm331_vm5, %v913_v38, %v229_v43  ;;  %v651_v43 = vld [vmem:[%s1023_s23] sm:$0x1] (%p1005_p3) }
  0x67   : > { %v234_v49 = vsel %vm227_vm6, %v230_v47, %v233_v6  ;;  %v337_v44 = vsel %vm330_vm7, %v333_v48, %v336_v45  ;;  %652 = vst [vmem:[%s1127_s26] sm:$0x1] (%p1005_p3), %v651_v43 }
  0x68   : > { %v235_v50 = vsel %vm224_vm8, nan, %v234_v49  ;;  %v338_v51 = vsel %vm224_vm8, nan, %v337_v44 }
  0x69   : > { %827 = vst [vmem:[%s1023_s23 + $0x1] sm:$0x1] %v235_v50  ;;  %v343_v53 = vmul.f32 2.0, %v235_v50  ;;  %828 = vst [vmem:[%s1023_s23 + $0x2] sm:$0x1] %v338_v51  ;;  %v345_v54 = vsub.f32 %v338_v51, %v235_v50  ;;  %v346_v55 = vadd.f32 %v338_v51, %v235_v50 }
  0x6a   : > { %v917_v58 = vpop.eup %916 }
  0x6b   : > { %v344_v57 = vmul.f32 %v343_v53, %v338_v51  ;;  %v347_v0 = vmul.f32 %v346_v55, %v345_v54  ;;  %v919_v62 = vpop.eup %918  ;;  %v480_v4 = vxor.u32 2147483648, %v917_v58 }
  0x6c   : > { %v477_v8 = vxor.u32 2147483648, %v919_v62 }
  0x6d   : > { %829 = vst [vmem:[%s1023_s23 + $0x3] sm:$0x1] %v344_v57  ;;  %830 = vst [vmem:[%s1023_s23 + $0x4] sm:$0x1] %v347_v0  ;;  %v352_v59 = vmul.f32 2.0, %v344_v57  ;;  %v354_v60 = vsub.f32 %v347_v0, %v344_v57  ;;  %v355_v61 = vadd.f32 %v347_v0, %v344_v57  ;;  %v481_v9 = vsel %vm479_vm10, %v480_v4, %v919_v62 }
  0x6e   : > { %v584_v10 = vsel %vm582_vm9, %v480_v4, %v919_v62  ;;  %v478_v15 = vsel %vm476_vm11, %v917_v58, %v477_v8  ;;  %v581_v1 = vsel %vm579_vm12, %v917_v58, %v477_v8 }
  0x6f   : > { %v353_v5 = vmul.f32 %v352_v59, %v347_v0  ;;  %v356_v7 = vmul.f32 %v355_v61, %v354_v60  ;;  %v482_v63 = vsel %vm475_vm13, %v478_v15, %v481_v9  ;;  %v585_v21 = vsel %vm578_vm15, %v581_v1, %v584_v10 }
  0x70   : > { %v483_v20 = vsel %vm472_vm14, nan, %v482_v63  ;;  %v586_v22 = vsel %vm472_vm14, nan, %v585_v21  ;;  %v653_v6 = vld [vmem:[%s1023_s23 + $0x1] sm:$0x1] (%p1005_p3)  ;;  %v655_v45 = vld [vmem:[%s1023_s23 + $0x2] sm:$0x1] (%p1005_p3) }
  0x71   : > { %831 = vst [vmem:[%s1023_s23 + $0x5] sm:$0x1] %v353_v5  ;;  %832 = vst [vmem:[%s1023_s23 + $0x6] sm:$0x1] %v356_v7  ;;  %v361_v11 = vmul.f32 2.0, %v353_v5  ;;  %v363_v12 = vsub.f32 %v356_v7, %v353_v5  ;;  %v364_v14 = vadd.f32 %v356_v7, %v353_v5  ;;  %v591_v18 = vmul.f32 2.0, %v483_v20 }
  0x72   : > { %845 = vst [vmem:[%s1023_s23 + $0xb] sm:$0x1] %v483_v20  ;;  %846 = vst [vmem:[%s1023_s23 + $0xc] sm:$0x1] %v586_v22  ;;  %v593_v26 = vsub.f32 %v586_v22, %v483_v20  ;;  %v594_v27 = vadd.f32 %v586_v22, %v483_v20 }
  0x73   : > { %v362_v16 = vmul.f32 %v361_v11, %v356_v7  ;;  %v365_v17 = vmul.f32 %v364_v14, %v363_v12  ;;  %v592_v28 = vmul.f32 %v591_v18, %v586_v22  ;;  %654 = vst [vmem:[%s1127_s26 + $0x3] sm:$0x1] (%p1005_p3), %v653_v6  ;;  %656 = vst [vmem:[%s1127_s26 + $0x6] sm:$0x1] (%p1005_p3), %v655_v45 }
  0x74   : > { %v595_v3 = vmul.f32 %v594_v27, %v593_v26  ;;  %v657_v46 = vld [vmem:[%s1023_s23 + $0x3] sm:$0x1] (%p1005_p3)  ;;  %v659_v47 = vld [vmem:[%s1023_s23 + $0x4] sm:$0x1] (%p1005_p3) }
  0x75   : > { %833 = vst [vmem:[%s1023_s23 + $0x7] sm:$0x1] %v362_v16  ;;  %834 = vst [vmem:[%s1023_s23 + $0x8] sm:$0x1] %v365_v17  ;;  %v370_v23 = vmul.f32 2.0, %v362_v16  ;;  %v372_v24 = vsub.f32 %v365_v17, %v362_v16  ;;  %v373_v25 = vadd.f32 %v365_v17, %v362_v16  ;;  %v600_v31 = vmul.f32 2.0, %v592_v28 }
  0x76   : > { %847 = vst [vmem:[%s1023_s23 + $0xd] sm:$0x1] %v592_v28  ;;  %848 = vst [vmem:[%s1023_s23 + $0xe] sm:$0x1] %v595_v3  ;;  %v602_v13 = vsub.f32 %v595_v3, %v592_v28  ;;  %v603_v19 = vadd.f32 %v595_v3, %v592_v28 }
  0x77   : > { %v371_v29 = vmul.f32 %v370_v23, %v365_v17  ;;  %v374_v30 = vmul.f32 %v373_v25, %v372_v24  ;;  %v601_v32 = vmul.f32 %v600_v31, %v595_v3  ;;  %658 = vst [vmem:[%s1127_s26 + $0x9] sm:$0x1] (%p1005_p3), %v657_v46  ;;  %660 = vst [vmem:[%s1127_s26 + $0xc] sm:$0x1] (%p1005_p3), %v659_v47 }
  0x78   : > { %v604_v33 = vmul.f32 %v603_v19, %v602_v13  ;;  %v661_v48 = vld [vmem:[%s1023_s23 + $0x5] sm:$0x1] (%p1005_p3)  ;;  %v663_v49 = vld [vmem:[%s1023_s23 + $0x6] sm:$0x1] (%p1005_p3) }
  0x79   : > { %835 = vst [vmem:[%s1023_s23 + $0x9] sm:$0x1] %v371_v29  ;;  %836 = vst [vmem:[%s1023_s23 + $0xa] sm:$0x1] %v374_v30  ;;  %v609_v34 = vmul.f32 2.0, %v601_v32 }
  0x7a   : > { %849 = vst [vmem:[%s1023_s23 + $0xf] sm:$0x1] %v601_v32  ;;  %850 = vst [vmem:[%s1023_s23 + $0x10] sm:$0x1] %v604_v33  ;;  %v611_v35 = vsub.f32 %v604_v33, %v601_v32  ;;  %v612_v36 = vadd.f32 %v604_v33, %v601_v32  ;;  %v673_v53 = vld [vmem:[%s1023_s23 + $0xb] sm:$0x1] (%p1005_p3) }
  0x7b   : > { %v610_v2 = vmul.f32 %v609_v34, %v604_v33  ;;  %662 = vst [vmem:[%s1127_s26 + $0xf] sm:$0x1] (%p1005_p3), %v661_v48  ;;  %664 = vst [vmem:[%s1127_s26 + $0x12] sm:$0x1] (%p1005_p3), %v663_v49  ;;  %v675_v54 = vld [vmem:[%s1023_s23 + $0xc] sm:$0x1] (%p1005_p3) }
  0x7c   : > { %v613_v37 = vmul.f32 %v612_v36, %v611_v35  ;;  %633 = sbr.rel (!%p1005_p3) target bundleno = 139 (0x8b), region = 28  ;;  %v665_v44 = vld [vmem:[%s1023_s23 + $0x7] sm:$0x1] (%p1005_p3)  ;;  %v667_v50 = vld [vmem:[%s1023_s23 + $0x8] sm:$0x1] (%p1005_p3) }
  0x7d   : > { %851 = vst [vmem:[%s1023_s23 + $0x11] sm:$0x1] %v610_v2  ;;  %v618_v38 = vmul.f32 2.0, %v610_v2  ;;  %666 = vst [vmem:[%s1127_s26 + $0x15] sm:$0x1] (%p1005_p3), %v665_v44 }
  0x7e   : > { %852 = vst [vmem:[%s1023_s23 + $0x12] sm:$0x1] %v613_v37  ;;  %v620_v40 = vsub.f32 %v613_v37, %v610_v2  ;;  %v621_v41 = vadd.f32 %v613_v37, %v610_v2  ;;  %668 = vst [vmem:[%s1127_s26 + $0x18] sm:$0x1] (%p1005_p3), %v667_v50  ;;  %v677_v55 = vld [vmem:[%s1023_s23 + $0xd] sm:$0x1] (%p1005_p3) }
  0x7f   : > { %v619_v39 = vmul.f32 %v618_v38, %v613_v37  ;;  %674 = vst [vmem:[%s1127_s26 + $0x21] sm:$0x1] (%p1005_p3), %v673_v53  ;;  %v679_v56 = vld [vmem:[%s1023_s23 + $0xe] sm:$0x1] (%p1005_p3)  ;;  %676 = vst [vmem:[%s1127_s26 + $0x24] sm:$0x1] (%p1005_p3), %v675_v54 }
  0x80   : > { %v622_v42 = vmul.f32 %v621_v41, %v620_v40  ;;  %v669_v51 = vld [vmem:[%s1023_s23 + $0x9] sm:$0x1] (%p1005_p3)  ;;  %v671_v52 = vld [vmem:[%s1023_s23 + $0xa] sm:$0x1] (%p1005_p3)  ;;  %678 = vst [vmem:[%s1127_s26 + $0x27] sm:$0x1] (%p1005_p3), %v677_v55 }
  0x81   : > { %853 = vst [vmem:[%s1023_s23 + $0x13] sm:$0x1] %v619_v39  ;;  %670 = vst [vmem:[%s1127_s26 + $0x1b] sm:$0x1] (%p1005_p3), %v669_v51  ;;  %v681_v57 = vld [vmem:[%s1023_s23 + $0xf] sm:$0x1] (%p1005_p3) }
  0x82   : > { %854 = vst [vmem:[%s1023_s23 + $0x14] sm:$0x1] %v622_v42  ;;  %672 = vst [vmem:[%s1127_s26 + $0x1e] sm:$0x1] (%p1005_p3), %v671_v52  ;;  %v683_v0 = vld [vmem:[%s1023_s23 + $0x10] sm:$0x1] (%p1005_p3) }
  0x83   : > { %680 = vst [vmem:[%s1127_s26 + $0x2a] sm:$0x1] %v679_v56  ;;  %682 = vst [vmem:[%s1127_s26 + $0x2d] sm:$0x1] %v681_v57 }
  0x84   : > { %v685_v58 = vld [vmem:[%s1023_s23 + $0x11] sm:$0x1]  ;;  %684 = vst [vmem:[%s1127_s26 + $0x30] sm:$0x1] %v683_v0 }
  0x85   : > { %686 = vst [vmem:[%s1127_s26 + $0x33] sm:$0x1] %v685_v58  ;;  %v687_v59 = vld [vmem:[%s1023_s23 + $0x12] sm:$0x1] }
  0x86   : > { %688 = vst [vmem:[%s1127_s26 + $0x36] sm:$0x1] %v687_v59 }
  0x88   : > { %v689_v60 = vld [vmem:[%s1023_s23 + $0x13] sm:$0x1] }
  0x89   : > { %v691_v61 = vld [vmem:[%s1023_s23 + $0x14] sm:$0x1]  ;;  %690 = vst [vmem:[%s1127_s26 + $0x39] sm:$0x1] %v689_v60 }
  0x8a   : > { %692 = vst [vmem:[%s1127_s26 + $0x3c] sm:$0x1] %v691_v61 }
  0x8b PF: > { %s11_s10 = sadd.s32 1, %s958_s10   ;;  %s1189_s6 = smov %s946_s7 }
  0x8c   : > { %p8_p9 = scmp.ge.s32.totalorder %s11_s10, 5   ;;  %s1190_s7 = smov %s1014_s16 }
  0x8d   : > { %s1191_s8 = smov %s954_s9  ;;  %s1192_s9 = smov %s1194_s12 }
  0x8e   :  { %10 = sbr.rel (!%p8_p9) target bundleno = 3 (0x3), region = 115 }

</bundles_post_ra>
